<compile_context>
chip_gen: v5e
topology: v5e:2x2
jax: 0.10.0
libtpu: 0.0.40
codegen_flags: <defaults>
</compile_context>

<pallas_src>
import functools

import jax
import jax.numpy as jnp
from jax.experimental import pallas as pl
from jax.experimental.pallas import tpu as pltpu


def _round_up(n: int, m: int) -> int:
    return ((n + m - 1) // m) * m


# ---------------------------------------------------------------------------
# Shared in-kernel MLP body: (Linear -> ReLU) for every layer, including the
# output layer (the PyTorch module applies ReLU after the final Linear too).
# ---------------------------------------------------------------------------
def _run_mlp(x, layer_refs, n_layers, matmul_dtype):
    h = x
    for li in range(n_layers):
        w_ref = layer_refs[2 * li]
        b_ref = layer_refs[2 * li + 1]
        h = jnp.dot(h.astype(matmul_dtype), w_ref[...],
                    preferred_element_type=jnp.float32)     # MXU, f32 accumulate
        h = jnp.maximum(h + b_ref[...], 0.0)                 # bias + ReLU on VPU (f32)
    return h


# ---------------------------------------------------------------------------
# Kernel A: MLP only (action_size == 1, no softmax).
# ---------------------------------------------------------------------------
def _make_mlp_kernel(n_layers: int, matmul_dtype):
    def kernel(*refs):
        x_ref = refs[0]
        layer_refs = refs[1:1 + 2 * n_layers]
        out_ref = refs[1 + 2 * n_layers]
        out_ref[...] = _run_mlp(x_ref[...], layer_refs, n_layers, matmul_dtype)
    return kernel


# ---------------------------------------------------------------------------
# Kernel B: fully fused MLP + dim-0 softmax (single row-tile case).
# ---------------------------------------------------------------------------
def _make_fused_softmax_kernel(n_layers: int, batch: int, tile_b: int, matmul_dtype):
    def kernel(*refs):
        x_ref = refs[0]
        layer_refs = refs[1:1 + 2 * n_layers]
        out_ref = refs[1 + 2 * n_layers]

        h = _run_mlp(x_ref[...], layer_refs, n_layers, matmul_dtype)

        # Mask zero-padded rows so they do not pollute the column-wise softmax.
        row = jax.lax.broadcasted_iota(jnp.int32, (tile_b, 1), 0)
        s = jnp.where(row < batch, h, -jnp.inf)
        m = jnp.max(s, axis=0, keepdims=True)
        p = jnp.exp(s - m)
        l = jnp.sum(p, axis=0, keepdims=True)
        out_ref[...] = p * pl.reciprocal(l, approx=True)     # EUP slot, ~free
    return kernel


# ---------------------------------------------------------------------------
# Kernel C: fused MLP + online dim-0 softmax statistics (multi-tile case).
# ---------------------------------------------------------------------------
def _make_mlp_stats_kernel(n_layers: int, batch: int, tile_b: int, matmul_dtype):
    def kernel(*refs):
        x_ref = refs[0]
        layer_refs = refs[1:1 + 2 * n_layers]
        logits_ref, m_ref, l_ref = refs[1 + 2 * n_layers:]

        step = pl.program_id(0)

        @pl.when(step == 0)
        def _init():
            m_ref[...] = jnp.full_like(m_ref, -jnp.inf)
            l_ref[...] = jnp.zeros_like(l_ref)

        h = _run_mlp(x_ref[...], layer_refs, n_layers, matmul_dtype)
        logits_ref[...] = h

        # Online dim-0 (batch-axis) max / sum-exp accumulation across tiles.
        row = step * tile_b + jax.lax.broadcasted_iota(jnp.int32, (tile_b, 1), 0)
        s = jnp.where(row < batch, h, -jnp.inf)

        m_old = m_ref[...]
        m_new = jnp.maximum(m_old, jnp.max(s, axis=0, keepdims=True))
        l_ref[...] = (l_ref[...] * jnp.exp(m_old - m_new)
                      + jnp.sum(jnp.exp(s - m_new), axis=0, keepdims=True))
        m_ref[...] = m_new
    return kernel


# ---------------------------------------------------------------------------
# Kernel D: normalize logits with the global (dim-0) max / sum-exp.
# ---------------------------------------------------------------------------
def _softmax_normalize_kernel(logits_ref, m_ref, l_ref, out_ref):
    inv_l = pl.reciprocal(l_ref[...], approx=True)
    out_ref[...] = jnp.exp(logits_ref[...] - m_ref[...]) * inv_l


# ---------------------------------------------------------------------------
# Parameter preparation: pad every feature dim to a multiple of 128 (lane
# dense), cast matmul operands to bf16 once if requested. Biases stay f32.
# ---------------------------------------------------------------------------
def prepare_params(params, n_layers: int, use_bf16_matmul: bool = True):
    w_dtype = jnp.bfloat16 if use_bf16_matmul else jnp.float32
    prepared = {}
    for i in range(1, n_layers + 1):
        w = params[f"w{i}"]
        b = params[f"b{i}"]
        fin, fout = w.shape
        fin_p, fout_p = _round_up(fin, 128), _round_up(fout, 128)
        w_p = jnp.zeros((fin_p, fout_p), jnp.float32).at[:fin, :fout].set(w)
        b_p = jnp.zeros((1, fout_p), jnp.float32).at[:, :fout].set(b)
        prepared[f"w{i}"] = w_p.astype(w_dtype)
        prepared[f"b{i}"] = b_p
    return prepared


# ---------------------------------------------------------------------------
# Forward wrapper.
# ---------------------------------------------------------------------------
@functools.partial(
    jax.jit,
    static_argnames=("n_layers", "action_size", "tile_b", "use_bf16_matmul"))
def simple_network_forward(x, prepared, *, n_layers, action_size,
                           tile_b=512, use_bf16_matmul=True):
    """x: (B, state_size) f32.  Returns (B, action_size) f32."""
    B, S = x.shape
    S_pad = prepared["w1"].shape[0]
    A_pad = prepared[f"w{n_layers}"].shape[1]
    mm_dtype = jnp.bfloat16 if use_bf16_matmul else jnp.float32

    # Row tile: multiple of 8 sublanes; never larger than the padded batch.
    TB = min(_round_up(tile_b, 8), _round_up(B, 8))
    B_pad = _round_up(B, TB)
    n_tiles = B_pad // TB
    grid = (n_tiles,)

    x_p = jnp.zeros((B_pad, S_pad), mm_dtype).at[:B, :S].set(x.astype(mm_dtype))

    # x streams in row tiles; weights & biases are VMEM-resident (constant maps).
    in_specs = [pl.BlockSpec((TB, S_pad), lambda i: (i, 0))]
    args = [x_p]
    for li in range(1, n_layers + 1):
        w = prepared[f"w{li}"]
        b = prepared[f"b{li}"]
        in_specs.append(pl.BlockSpec(w.shape, lambda i: (0, 0)))
        in_specs.append(pl.BlockSpec(b.shape, lambda i: (0, 0)))
        args += [w, b]

    out_tile_spec = pl.BlockSpec((TB, A_pad), lambda i: (i, 0))

    # --- path 1: action_size == 1 -> PyTorch module skips the Softmax ---
    if action_size == 1:
        logits = pl.pallas_call(
            _make_mlp_kernel(n_layers, mm_dtype),
            grid=grid,
            in_specs=in_specs,
            out_specs=out_tile_spec,
            out_shape=jax.ShapeDtypeStruct((B_pad, A_pad), jnp.float32),
            compiler_params=pltpu.CompilerParams(
                dimension_semantics=("parallel",)),
        )(*args)
        return logits[:B, :1]

    # --- path 2: whole batch fits in one tile -> fully fused single call ---
    if n_tiles == 1:
        probs = pl.pallas_call(
            _make_fused_softmax_kernel(n_layers, B, TB, mm_dtype),
            grid=grid,
            in_specs=in_specs,
            out_specs=out_tile_spec,
            out_shape=jax.ShapeDtypeStruct((B_pad, A_pad), jnp.float32),
            compiler_params=pltpu.CompilerParams(
                dimension_semantics=("arbitrary",)),
        )(*args)
        return probs[:B, :action_size]

    # --- path 3: multi-tile batch ---
    # Kernel C: MLP + online softmax stats (grid axis is a reduction -> arbitrary).
    logits, m, l = pl.pallas_call(
        _make_mlp_stats_kernel(n_layers, B, TB, mm_dtype),
        grid=grid,
        in_specs=in_specs,
        out_specs=(out_tile_spec,
                   pl.BlockSpec((1, A_pad), lambda i: (0, 0)),
                   pl.BlockSpec((1, A_pad), lambda i: (0, 0))),
        out_shape=(jax.ShapeDtypeStruct((B_pad, A_pad), jnp.float32),
                   jax.ShapeDtypeStruct((1, A_pad), jnp.float32),
                   jax.ShapeDtypeStruct((1, A_pad), jnp.float32)),
        compiler_params=pltpu.CompilerParams(
            dimension_semantics=("arbitrary",)),
    )(*args)

    # Kernel D: normalize with the global dim-0 max / sum-exp.
    probs = pl.pallas_call(
        _softmax_normalize_kernel,
        grid=grid,
        in_specs=[out_tile_spec,
                  pl.BlockSpec((1, A_pad), lambda i: (0, 0)),
                  pl.BlockSpec((1, A_pad), lambda i: (0, 0))],
        out_specs=out_tile_spec,
        out_shape=jax.ShapeDtypeStruct((B_pad, A_pad), jnp.float32),
        compiler_params=pltpu.CompilerParams(
            dimension_semantics=("parallel",)),
    )(logits, m, l)

    return probs[:B, :action_size]


# ---------------------------------------------------------------------------
# Init + pure-JAX reference.
# ---------------------------------------------------------------------------
def init_params(key, state_size, hidden_sizes, action_size):
    """PyTorch-nn.Linear-style init; weights stored transposed (in, out)."""
    sizes = [state_size] + list(hidden_sizes) + [action_size]
    params = {}
    for i in range(len(sizes) - 1):
        fan_in, fan_out = sizes[i], sizes[i + 1]
        key, kw, kb = jax.random.split(key, 3)
        bound = 1.0 / jnp.sqrt(jnp.float32(fan_in))
        params[f"w{i + 1}"] = jax.random.uniform(
            kw, (fan_in, fan_out), jnp.float32, -bound, bound)
        params[f"b{i + 1}"] = jax.random.uniform(
            kb, (1, fan_out), jnp.float32, -bound, bound)
    return params


def reference_forward(x, params, n_layers, action_size):
    h = x
    for i in range(1, n_layers + 1):
        h = jnp.matmul(h, params[f"w{i}"],
                       precision=jax.lax.Precision.HIGHEST) + params[f"b{i}"]
        h = jnp.maximum(h, 0.0)
    if action_size > 1:
        h = jax.nn.softmax(h, axis=0)   # Softmax(dim=0)
    return h


if __name__ == "__main__":
    state_size = 16
    hidden_sizes = [32, 32]
    n_layers = len(hidden_sizes) + 1

    key = jax.random.PRNGKey(0)
    key, kx1, kx2, kx3 = jax.random.split(key, 4)

    # Case 1: action_size > 1, small batch -> fully fused single-tile path (f32 MXU).
    action_size = 4
    params = init_params(key, state_size, hidden_sizes, action_size)
    x_small = jax.random.normal(kx1, (8, state_size), jnp.float32)
    prep_f32 = prepare_params(params, n_layers, use_bf16_matmul=False)
    out_small = jax.block_until_ready(simple_network_forward(
        x_small, prep_f32, n_layers=n_layers, action_size=action_size,
        tile_b=512, use_bf16_matmul=False))
    ref_small = reference_forward(x_small, params, n_layers, action_size)
    assert out_small.shape == (8, action_size)
    assert jnp.allclose(out_small, ref_small, atol=2e-3, rtol=2e-3), \
        "fused f32 path mismatch vs reference"

    # Case 2: action_size > 1, batch spanning several grid tiles with row
    # masking (300 rows, tile 128 -> 3 tiles, 84 padded rows), bf16 MXU + f32 acc.
    x_big = jax.random.normal(kx2, (300, state_size), jnp.float32)
    prep_bf16 = prepare_params(params, n_layers, use_bf16_matmul=True)
    out_big = jax.block_until_ready(simple_network_forward(
        x_big, prep_bf16, n_layers=n_layers, action_size=action_size,
        tile_b=128, use_bf16_matmul=True))
    ref_big = reference_forward(x_big, params, n_layers, action_size)
    assert out_big.shape == (300, action_size)
    assert jnp.allclose(out_big, ref_big, atol=1e-3, rtol=5e-2), \
        "bf16 multi-tile path mismatch vs reference"

    # Case 3: action_size == 1 -> no softmax (matches the PyTorch module).
    params1 = init_params(jax.random.PRNGKey(1), state_size, hidden_sizes, 1)
    x1 = jax.random.normal(kx3, (16, state_size), jnp.float32)
    prep1 = prepare_params(params1, n_layers, use_bf16_matmul=False)
    out1 = jax.block_until_ready(simple_network_forward(
        x1, prep1, n_layers=n_layers, action_size=1,
        tile_b=512, use_bf16_matmul=False))
    ref1 = reference_forward(x1, params1, n_layers, 1)
    assert out1.shape == (16, 1)
    assert jnp.allclose(out1, ref1, atol=2e-3, rtol=2e-3), \
        "action_size==1 path mismatch vs reference"

    print("KERNEL_OK")
</pallas_src>

<mosaic_0001>
module attributes {stable_mosaic.version = 11 : i64} {
  func.func @kernel(%arg0: i32, %arg1: memref<8x128xf32, #tpu.memory_space<vmem>>, %arg2: memref<128x128xf32, #tpu.memory_space<vmem>>, %arg3: memref<1x128xf32, #tpu.memory_space<vmem>>, %arg4: memref<128x128xf32, #tpu.memory_space<vmem>>, %arg5: memref<1x128xf32, #tpu.memory_space<vmem>>, %arg6: memref<128x128xf32, #tpu.memory_space<vmem>>, %arg7: memref<1x128xf32, #tpu.memory_space<vmem>>, %arg8: memref<8x128xf32, #tpu.memory_space<vmem>>) attributes {dimension_semantics = [#tpu.dimension_semantics<arbitrary>], iteration_bounds = array<i64: 1>, scalar_prefetch = 0 : i64, scratch_operands = 0 : i64, tpu.core_type = #tpu.core_type<tc>, window_params = [{transform_indices = @transform_0, window_bounds = array<i64: 8, 128>}, {pipeline_mode = #tpu.pipeline_mode<synchronous>, transform_indices = @transform_1, window_bounds = array<i64: 128, 128>}, {pipeline_mode = #tpu.pipeline_mode<synchronous>, transform_indices = @transform_2, window_bounds = array<i64: 1, 128>}, {pipeline_mode = #tpu.pipeline_mode<synchronous>, transform_indices = @transform_3, window_bounds = array<i64: 128, 128>}, {pipeline_mode = #tpu.pipeline_mode<synchronous>, transform_indices = @transform_4, window_bounds = array<i64: 1, 128>}, {pipeline_mode = #tpu.pipeline_mode<synchronous>, transform_indices = @transform_5, window_bounds = array<i64: 128, 128>}, {pipeline_mode = #tpu.pipeline_mode<synchronous>, transform_indices = @transform_6, window_bounds = array<i64: 1, 128>}, {transform_indices = @transform_7, window_bounds = array<i64: 8, 128>}]} {
    %c0 = arith.constant 0 : index
    %c0_0 = arith.constant 0 : index
    %0 = vector.load %arg1[%c0, %c0_0] : memref<8x128xf32, #tpu.memory_space<vmem>>, vector<8x128xf32>
    %c0_1 = arith.constant 0 : index
    %c0_2 = arith.constant 0 : index
    %1 = vector.load %arg2[%c0_1, %c0_2] : memref<128x128xf32, #tpu.memory_space<vmem>>, vector<128x128xf32>
    %cst = arith.constant dense<0.000000e+00> : vector<8x128xf32>
    %2 = tpu.matmul %0, %1, %cst {dimension_numbers = #tpu.dot_dimension_numbers<[1], [0], [0], [1], [0, 0, 1, 1], [], []>} : vector<8x128xf32>, vector<128x128xf32>, vector<8x128xf32> -> vector<8x128xf32>
    %c0_3 = arith.constant 0 : index
    %c0_4 = arith.constant 0 : index
    %3 = vector.load %arg3[%c0_3, %c0_4] : memref<1x128xf32, #tpu.memory_space<vmem>>, vector<1x128xf32>
    %4 = vector.broadcast %3 : vector<1x128xf32> to vector<8x128xf32>
    %5 = arith.addf %2, %4 : vector<8x128xf32>
    %cst_5 = arith.constant 0.000000e+00 : f32
    %6 = vector.broadcast %cst_5 : f32 to vector<8x128xf32>
    %7 = arith.maximumf %5, %6 : vector<8x128xf32>
    %c0_6 = arith.constant 0 : index
    %c0_7 = arith.constant 0 : index
    %8 = vector.load %arg4[%c0_6, %c0_7] : memref<128x128xf32, #tpu.memory_space<vmem>>, vector<128x128xf32>
    %cst_8 = arith.constant dense<0.000000e+00> : vector<8x128xf32>
    %9 = tpu.matmul %7, %8, %cst_8 {dimension_numbers = #tpu.dot_dimension_numbers<[1], [0], [0], [1], [0, 0, 1, 1], [], []>} : vector<8x128xf32>, vector<128x128xf32>, vector<8x128xf32> -> vector<8x128xf32>
    %c0_9 = arith.constant 0 : index
    %c0_10 = arith.constant 0 : index
    %10 = vector.load %arg5[%c0_9, %c0_10] : memref<1x128xf32, #tpu.memory_space<vmem>>, vector<1x128xf32>
    %11 = vector.broadcast %10 : vector<1x128xf32> to vector<8x128xf32>
    %12 = arith.addf %9, %11 : vector<8x128xf32>
    %cst_11 = arith.constant 0.000000e+00 : f32
    %13 = vector.broadcast %cst_11 : f32 to vector<8x128xf32>
    %14 = arith.maximumf %12, %13 : vector<8x128xf32>
    %c0_12 = arith.constant 0 : index
    %c0_13 = arith.constant 0 : index
    %15 = vector.load %arg6[%c0_12, %c0_13] : memref<128x128xf32, #tpu.memory_space<vmem>>, vector<128x128xf32>
    %cst_14 = arith.constant dense<0.000000e+00> : vector<8x128xf32>
    %16 = tpu.matmul %14, %15, %cst_14 {dimension_numbers = #tpu.dot_dimension_numbers<[1], [0], [0], [1], [0, 0, 1, 1], [], []>} : vector<8x128xf32>, vector<128x128xf32>, vector<8x128xf32> -> vector<8x128xf32>
    %c0_15 = arith.constant 0 : index
    %c0_16 = arith.constant 0 : index
    %17 = vector.load %arg7[%c0_15, %c0_16] : memref<1x128xf32, #tpu.memory_space<vmem>>, vector<1x128xf32>
    %18 = vector.broadcast %17 : vector<1x128xf32> to vector<8x128xf32>
    %19 = arith.addf %16, %18 : vector<8x128xf32>
    %cst_17 = arith.constant 0.000000e+00 : f32
    %20 = vector.broadcast %cst_17 : f32 to vector<8x128xf32>
    %21 = arith.maximumf %19, %20 : vector<8x128xf32>
    %22 = tpu.iota {dimensions = array<i32: 0>} : vector<8x1xi32>
    %c8_i32 = arith.constant 8 : i32
    %23 = vector.broadcast %c8_i32 : i32 to vector<8x1xi32>
    %24 = arith.cmpi slt, %22, %23 : vector<8x1xi32>
    %cst_18 = arith.constant 0xFF800000 : f32
    %25 = vector.shape_cast %24 : vector<8x1xi1> to vector<8x1xi1>
    %26 = vector.broadcast %25 : vector<8x1xi1> to vector<8x128xi1>
    %27 = vector.broadcast %cst_18 : f32 to vector<8x128xf32>
    %28 = arith.select %26, %21, %27 : vector<8x128xi1>, vector<8x128xf32>
    %cst_19 = arith.constant dense<0xFF800000> : vector<128xf32>
    %29 = vector.multi_reduction <maximumf>, %28, %cst_19 [0] : vector<8x128xf32> to vector<128xf32>
    %30 = vector.shape_cast %29 : vector<128xf32> to vector<1x128xf32>
    %31 = vector.broadcast %30 : vector<1x128xf32> to vector<8x128xf32>
    %32 = arith.subf %28, %31 : vector<8x128xf32>
    %33 = math.exp %32 : vector<8x128xf32>
    %cst_20 = arith.constant dense<0.000000e+00> : vector<128xf32>
    %34 = vector.multi_reduction <add>, %33, %cst_20 [0] : vector<8x128xf32> to vector<128xf32>
    %35 = vector.shape_cast %34 : vector<128xf32> to vector<1x128xf32>
    %36 = tpu.reciprocal %35 {approx = true} : vector<1x128xf32> -> vector<1x128xf32>
    %37 = vector.broadcast %36 : vector<1x128xf32> to vector<8x128xf32>
    %38 = arith.mulf %33, %37 : vector<8x128xf32>
    %c0_21 = arith.constant 0 : index
    %c0_22 = arith.constant 0 : index
    %39 = vector.load %arg8[%c0_21, %c0_22] : memref<8x128xf32, #tpu.memory_space<vmem>>, vector<8x128xf32>
    tpu.vector_store %arg8[%c0_21, %c0_22], %38 {strides = array<i32>} : memref<8x128xf32, #tpu.memory_space<vmem>>, vector<8x128xf32>,
    return
  }
  func.func @transform_0(%arg0: i32) -> (i32, i32) {
    %c0_i32 = arith.constant 0 : i32
    %c0_i32_0 = arith.constant 0 : i32
    return %arg0, %c0_i32 : i32, i32
  }
  func.func @transform_1(%arg0: i32) -> (i32, i32) {
    %c0_i32 = arith.constant 0 : i32
    %c0_i32_0 = arith.constant 0 : i32
    %c0_i32_1 = arith.constant 0 : i32
    return %c0_i32, %c0_i32_0 : i32, i32
  }
  func.func @transform_2(%arg0: i32) -> (i32, i32) {
    %c0_i32 = arith.constant 0 : i32
    %c0_i32_0 = arith.constant 0 : i32
    %c0_i32_1 = arith.constant 0 : i32
    return %c0_i32, %c0_i32_0 : i32, i32
  }
  func.func @transform_3(%arg0: i32) -> (i32, i32) {
    %c0_i32 = arith.constant 0 : i32
    %c0_i32_0 = arith.constant 0 : i32
    %c0_i32_1 = arith.constant 0 : i32
    return %c0_i32, %c0_i32_0 : i32, i32
  }
  func.func @transform_4(%arg0: i32) -> (i32, i32) {
    %c0_i32 = arith.constant 0 : i32
    %c0_i32_0 = arith.constant 0 : i32
    %c0_i32_1 = arith.constant 0 : i32
    return %c0_i32, %c0_i32_0 : i32, i32
  }
  func.func @transform_5(%arg0: i32) -> (i32, i32) {
    %c0_i32 = arith.constant 0 : i32
    %c0_i32_0 = arith.constant 0 : i32
    %c0_i32_1 = arith.constant 0 : i32
    return %c0_i32, %c0_i32_0 : i32, i32
  }
  func.func @transform_6(%arg0: i32) -> (i32, i32) {
    %c0_i32 = arith.constant 0 : i32
    %c0_i32_0 = arith.constant 0 : i32
    %c0_i32_1 = arith.constant 0 : i32
    return %c0_i32, %c0_i32_0 : i32, i32
  }
  func.func @transform_7(%arg0: i32) -> (i32, i32) {
    %c0_i32 = arith.constant 0 : i32
    %c0_i32_0 = arith.constant 0 : i32
    return %arg0, %c0_i32 : i32, i32
  }
}

</mosaic_0001>

<bundles_post_ra>
// kernel: simple_network_forward.1
= control target key start
LH: loop header
LB: loop body
LE: loop exit
PB: predicated region body
PF: predicated region fallthrough
CT: control target
= control target key end

     0   :  { %12 = vsyncpa [#allocation3], 0  ;;  %s384_s0 = inlined_call_operand.vmem [shape: f32[8,128], index: 0, kind: input, shape index: {}]   ;;  %s385_s1 = inlined_call_operand.hbm [shape: f32[128,128], index: 1, kind: input, shape index: {}]   ;;  %s386_s2 = inlined_call_operand.vmem [shape: f32[1,128], index: 2, kind: input, shape index: {}]   ;;  %s387_s3 = inlined_call_operand.hbm [shape: f32[128,128], index: 3, kind: input, shape index: {}]   ;;  %s388_s4 = inlined_call_operand.vmem [shape: f32[1,128], index: 4, kind: input, shape index: {}]   ;;  %s389_s5 = inlined_call_operand.hbm [shape: f32[128,128], index: 5, kind: input, shape index: {}]   ;;  %s390_s6 = inlined_call_operand.vmem [shape: f32[1,128], index: 6, kind: input, shape index: {}]   ;;  %s391_s7 = inlined_call_operand.vmem [shape: f32[8,128], index: 7, kind: output, shape index: {}]  }
   0x1   :  { %13 = vsyncpa [#allocation5], 0  ;;  %s35_s26 = sshll.u32 %s387_s3, 4  ;;  %s315_s27 = smov [#allocation4]   ;;  %s36_s26 = int_to_ptr.hbm [resolvable:$true] %s35_s26 }
   0x2   :  { %s37_s28 = sshll.u32 %s315_s27, 4  ;;  %s20_s8 = sshll.u32 %s385_s1, 4  ;;  %s38_s28 = int_to_ptr.vmem [resolvable:$true] %s37_s28  ;;  %s21_s8 = int_to_ptr.hbm [resolvable:$true] %s20_s8 }
   0x3   :  { %s316_s9 = smov 128   ;;  %s317_s10 = smov 8  }
   0x4   :  { %43 = dma.hbm_to_vmem [thread:$0]  %s36_s26, 2048, %s38_s28, [#allocation5], %s316_s9, %s316_s9, %s317_s10  }
   0x5   :  { %s318_s11 = smov [#allocation2]   ;;  %s50_s15 = sshll.u32 %s389_s5, 4  ;;  %s51_s15 = int_to_ptr.hbm [resolvable:$true] %s50_s15 }
   0x6   :  { %s22_s12 = sshll.u32 %s318_s11, 4  ;;  %s319_s3 = smov [#allocation6]   ;;  %s23_s12 = int_to_ptr.vmem [resolvable:$true] %s22_s12 }
   0x7   :  { %28 = dma.hbm_to_vmem [thread:$0]  %s21_s8, 2048, %s23_s12, [#allocation3], %s316_s9, %s316_s9, %s317_s10  }
   0x8   :  { %s52_s16 = sshll.u32 %s319_s3, 4  ;;  %s53_s16 = int_to_ptr.vmem [resolvable:$true] %s52_s16 }
   0x9   :  { %58 = dma.hbm_to_vmem [thread:$0]  %s51_s15, 2048, %s53_s16, [#allocation5], %s316_s9, %s316_s9, %s317_s10  }
   0xa   :  { %311 = dma.done.wait [#allocation3], 2048  }
   0xb   :  { %312 = vsyncadd [#allocation3], 4294965248 }
   0xc   :  { %313 = dma.done.wait [#allocation5], 4096  }
   0xd   :  { %314 = vsyncadd [#allocation5], 4294963200  ;;  %v89_v0 = vld [vmem:[#allocation2 + $0x78] sm:$0xff]  ;;  %v88_v1 = vld [vmem:[#allocation2 + $0x70] sm:$0xff] }
   0xe   :  { %94 = vmatpush.msra.mxu0 %v89_v0  ;;  %v87_v2 = vld [vmem:[#allocation2 + $0x68] sm:$0xff]  ;;  %v86_v3 = vld [vmem:[#allocation2 + $0x60] sm:$0xff]  ;;  %v130_v4 = vld [vmem:[#allocation4 + $0x78] sm:$0xff] }
   0xf   :  { %v85_v5 = vld [vmem:[#allocation2 + $0x58] sm:$0xff]  ;;  %135 = vmatpush.msra.mxu1 %v130_v4  ;;  %v129_v6 = vld [vmem:[#allocation4 + $0x70] sm:$0xff]  ;;  %v128_v7 = vld [vmem:[#allocation4 + $0x68] sm:$0xff] }
  0x10   :  { %95 = vmatpush.msra.mxu0 %v88_v1  ;;  %v84_v8 = vld [vmem:[#allocation2 + $0x50] sm:$0xff]  ;;  %v127_v9 = vld [vmem:[#allocation4 + $0x60] sm:$0xff]  ;;  %v83_v10 = vld [vmem:[#allocation2 + $0x48] sm:$0xff] }
  0x11   :  { %136 = vmatpush.msra.mxu1 %v129_v6  ;;  %v126_v11 = vld [vmem:[#allocation4 + $0x58] sm:$0xff]  ;;  %v82_v12 = vld [vmem:[#allocation2 + $0x40] sm:$0xff]  ;;  %v125_v13 = vld [vmem:[#allocation4 + $0x50] sm:$0xff] }
  0x12   :  { %96 = vmatpush.msra.mxu0 %v87_v2  ;;  %v81_v14 = vld [vmem:[#allocation2 + $0x38] sm:$0xff]  ;;  %v124_v15 = vld [vmem:[#allocation4 + $0x48] sm:$0xff]  ;;  %v80_v16 = vld [vmem:[#allocation2 + $0x30] sm:$0xff] }
  0x13   :  { %137 = vmatpush.msra.mxu1 %v128_v7  ;;  %v123_v17 = vld [vmem:[#allocation4 + $0x40] sm:$0xff]  ;;  %v79_v18 = vld [vmem:[#allocation2 + $0x28] sm:$0xff]  ;;  %v122_v19 = vld [vmem:[#allocation4 + $0x38] sm:$0xff] }
  0x14   :  { %97 = vmatpush.msra.mxu0 %v86_v3  ;;  %v78_v20 = vld [vmem:[#allocation2 + $0x20] sm:$0xff]  ;;  %v121_v21 = vld [vmem:[#allocation4 + $0x30] sm:$0xff]  ;;  %v77_v22 = vld [vmem:[#allocation2 + $0x18] sm:$0xff] }
  0x15   :  { %138 = vmatpush.msra.mxu1 %v127_v9  ;;  %v120_v23 = vld [vmem:[#allocation4 + $0x28] sm:$0xff]  ;;  %v76_v24 = vld [vmem:[#allocation2 + $0x10] sm:$0xff]  ;;  %v119_v25 = vld [vmem:[#allocation4 + $0x20] sm:$0xff] }
  0x16   :  { %98 = vmatpush.msra.mxu0 %v85_v5  ;;  %v75_v26 = vld [vmem:[#allocation2 + $0x8] sm:$0xff]  ;;  %v118_v27 = vld [vmem:[#allocation4 + $0x18] sm:$0xff]  ;;  %v74_v28 = vld [vmem:[#allocation2] sm:$0xff] }
  0x17   :  { %139 = vmatpush.msra.mxu1 %v126_v11  ;;  %v73_v29 = vld [vmem:[%s384_s0] sm:$0xff]  ;;  %v117_v30 = vld [vmem:[#allocation4 + $0x10] sm:$0xff]  ;;  %v116_v31 = vld [vmem:[#allocation4 + $0x8] sm:$0xff] }
  0x18   :  { %99 = vmatpush.msra.mxu0 %v84_v8  ;;  %v115_v32 = vld [vmem:[#allocation4] sm:$0xff]  ;;  %v171_v33 = vld [vmem:[#allocation6 + $0x78] sm:$0xff]  ;;  %v170_v34 = vld [vmem:[#allocation6 + $0x70] sm:$0xff] }
  0x19   :  { %140 = vmatpush.msra.mxu1 %v125_v13  ;;  %176 = vmatpush.msra.mxu2 %v171_v33  ;;  %v169_v35 = vld [vmem:[#allocation6 + $0x68] sm:$0xff]  ;;  %v168_v36 = vld [vmem:[#allocation6 + $0x60] sm:$0xff]  ;;  %v167_v37 = vld [vmem:[#allocation6 + $0x58] sm:$0xff] }
  0x1a   :  { %100 = vmatpush.msra.mxu0 %v83_v10  ;;  %v166_v38 = vld [vmem:[#allocation6 + $0x50] sm:$0xff]  ;;  %v165_v39 = vld [vmem:[#allocation6 + $0x48] sm:$0xff]  ;;  %v164_v40 = vld [vmem:[#allocation6 + $0x40] sm:$0xff] }
  0x1b   :  { %141 = vmatpush.msra.mxu1 %v124_v15  ;;  %177 = vmatpush.msra.mxu2 %v170_v34  ;;  %v163_v41 = vld [vmem:[#allocation6 + $0x38] sm:$0xff]  ;;  %v162_v42 = vld [vmem:[#allocation6 + $0x30] sm:$0xff]  ;;  %v161_v43 = vld [vmem:[#allocation6 + $0x28] sm:$0xff] }
  0x1c   :  { %101 = vmatpush.msra.mxu0 %v82_v12  ;;  %v160_v44 = vld [vmem:[#allocation6 + $0x20] sm:$0xff]  ;;  %v159_v45 = vld [vmem:[#allocation6 + $0x18] sm:$0xff]  ;;  %v158_v50 = vld [vmem:[#allocation6 + $0x10] sm:$0xff] }
  0x1d   :  { %142 = vmatpush.msra.mxu1 %v123_v17  ;;  %178 = vmatpush.msra.mxu2 %v169_v35  ;;  %v232_v46 = vld [vmem:[%s386_s2] ss:$0 sm:$0xff]  ;;  %v157_v51 = vld [vmem:[#allocation6 + $0x8] sm:$0xff] }
  0x1e   :  { %102 = vmatpush.msra.mxu0 %v81_v14  ;;  %v156_v52 = vld [vmem:[#allocation6] sm:$0xff] }
  0x1f   :  { %143 = vmatpush.msra.mxu1 %v122_v19  ;;  %179 = vmatpush.msra.mxu2 %v168_v36  ;;  %v233_v53 = vld [vmem:[%s388_s4] ss:$0 sm:$0xff] }
  0x20   :  { %103 = vmatpush.msra.mxu0 %v80_v16  ;;  %v234_v57 = vld [vmem:[%s390_s6] ss:$0 sm:$0xff] }
  0x21   :  { %144 = vmatpush.msra.mxu1 %v121_v21  ;;  %180 = vmatpush.msra.mxu2 %v167_v37 }
  0x22   :  { %104 = vmatpush.msra.mxu0 %v79_v18 }
  0x23   :  { %145 = vmatpush.msra.mxu1 %v120_v23  ;;  %181 = vmatpush.msra.mxu2 %v166_v38 }
  0x24   :  { %105 = vmatpush.msra.mxu0 %v78_v20 }
  0x25   :  { %146 = vmatpush.msra.mxu1 %v119_v25  ;;  %182 = vmatpush.msra.mxu2 %v165_v39 }
  0x26   :  { %106 = vmatpush.msra.mxu0 %v77_v22 }
  0x27   :  { %147 = vmatpush.msra.mxu1 %v118_v27  ;;  %183 = vmatpush.msra.mxu2 %v164_v40 }
  0x28   :  { %107 = vmatpush.msra.mxu0 %v76_v24 }
  0x29   :  { %148 = vmatpush.msra.mxu1 %v117_v30  ;;  %184 = vmatpush.msra.mxu2 %v163_v41 }
  0x2a   :  { %108 = vmatpush.msra.mxu0 %v75_v26 }
  0x2b   :  { %149 = vmatpush.msra.mxu1 %v116_v31  ;;  %185 = vmatpush.msra.mxu2 %v162_v42 }
  0x2c   :  { %109 = vmatpush.msra.mxu0 %v74_v28 }
  0x2d   :  { %110 = vmatmul.f32.vlgmr.msra.gmra.mxu0 %v73_v29  ;;  %150 = vmatpush.msra.mxu1 %v115_v32 }
  0x2e   :  { %186 = vmatpush.msra.mxu2 %v161_v43 }
  0x30   :  { %187 = vmatpush.msra.mxu2 %v160_v44 }
  0x32   :  { %188 = vmatpush.msra.mxu2 %v159_v45 }
  0x34   :  { %189 = vmatpush.msra.mxu2 %v158_v50 }
  0x36   :  { %190 = vmatpush.msra.mxu2 %v157_v51 }
  0x38   :  { %191 = vmatpush.msra.mxu2 %v156_v52 }
  0xaa   :  { %v111_v47 = vpop.f32.mrf.mxu0 }
  0xab   :  { %v112_v48 = vadd.f32 %v232_v46, %v111_v47 }
  0xad   :  { %v114_v49 = vmax.f32 %v112_v48, 0.0 }
  0xaf   :  { %151 = vmatmul.f32.vlgmr.msra.gmra.mxu1 %v114_v49 }
 0x12c   :  { %v152_v54 = vpop.f32.mrf.mxu1 }
 0x12d   :  { %v153_v55 = vadd.f32 %v233_v53, %v152_v54 }
 0x12f   :  { %v155_v56 = vmax.f32 %v153_v55, 0.0 }
 0x131   :  { %192 = vmatmul.f32.vlgmr.msra.gmra.mxu2 %v155_v56 }
 0x1b4   :  { %v193_v58 = vpop.f32.mrf.mxu2 }
 0x1b5   :  { %v194_v59 = vadd.f32 %v234_v57, %v193_v58 }
 0x1b7   :  { %v196_v60 = vmax.f32 %v194_v59, 0.0 }
 0x1b9   :  { %v203_v61 = vrot.slane %v196_v60, 4 }
 0x1bb   :  { %v204_v62 = vmax.f32 %v196_v60, %v203_v61 }
 0x1bd   :  { %v205_v63 = vrot.slane %v204_v62, 2 }
 0x1bf   :  { %v206_v0 = vmax.f32 %v204_v62, %v205_v63 }
 0x1c1   :  { %v207_v1 = vrot.slane %v206_v0, 1 }
 0x1c3   :  { %v208_v2 = vmax.f32 %v206_v0, %v207_v1 }
 0x1c5   :  { %v209_v3 = vsub.f32 %v196_v60, %v208_v2 }
 0x1c7   :  { %v210_v4 = vmul.f32 1.442695, %v209_v3 }
 0x1c9   :  { %235 = vpow2.f32 %v210_v4 }
 0x1cf   :  { %v236_v5 = vpop.eup %235 }
 0x1d0   :  { %v212_v6 = vrot.slane %v236_v5, 4 }
 0x1d2   :  { %v213_v7 = vadd.f32 %v236_v5, %v212_v6 }
 0x1d4   :  { %v214_v8 = vrot.slane %v213_v7, 2 }
 0x1d6   :  { %v215_v9 = vadd.f32 %v214_v8, %v213_v7 }
 0x1d8   :  { %v216_v10 = vrot.slane %v215_v9, 1 }
 0x1da   :  { %v217_v11 = vadd.f32 %v216_v10, %v215_v9 }
 0x1dc   :  { %237 = vrcp.f32 %v217_v11 }
 0x1e2   :  { %v238_v12 = vpop.eup %237 }
 0x1e3   :  { %v219_v13 = vmul.f32 %v238_v12, %v236_v5 }
 0x1e5   :  { %220 = vst [vmem:[%s391_s7] sm:$0xff] %v219_v13 }
 0x1e6   :  { %225 = vsyncpa [#allocation3], 1 }
 0x1e7   :  { %226 = vsyncpa [#allocation5], 1 }

</bundles_post_ra>
